<compile_context>
chip_gen: v7x
topology: tpu7x:2x2x1
jax: 0.10.0
libtpu: 0.0.40
codegen_flags: <defaults>
</compile_context>

<pallas_src>
import jax
import jax.numpy as jnp
from jax.experimental import pallas as pl
from jax.experimental.pallas import tpu as pltpu


def _head_dnn_kernel(a_ref, w_ref, o_ref):
    # a_ref: (tm, G*K)   w_ref: (G*K, G*N)   o_ref: (tm, G*N)
    acc = jnp.dot(a_ref[...], w_ref[...], preferred_element_type=jnp.float32)
    o_ref[...] = jnp.maximum(acc, 0.0).astype(o_ref.dtype)


def _default_lane_group():
    """256-wide MXU lane groups on v6e/v7x, 128 otherwise (v5e/v4)."""
    try:
        kind = jax.devices()[0].device_kind.lower()
    except Exception:
        return 128
    return 256 if ("v6" in kind or "v7" in kind) else 128


def _choose_group_heads(head, out_dim, in_dim, lane_group):
    """Largest divisor G of `head` whose group blocks are lane-aligned and fit
    the MXU lane group; falls back to a single group (full-extent blocks are
    always legal)."""
    g = min(head, max(1, lane_group // max(out_dim, 1)))
    while g >= 1:
        if head % g == 0 and (
            g == head or ((g * out_dim) % 128 == 0 and (g * in_dim) % 128 == 0)
        ):
            return g
        g -= 1
    return head


def build_grouped_weight(para, group_heads, dtype=None):
    """para: (1, H, K, N) -> (H//G, G*K, G*N) block-diagonal group weights.

    Pure function of `para`: build once at init (hoisted out of the per-call
    forward).  Built with zeros + slice updates instead of an HxH einsum.
    """
    _, H, K, N = para.shape
    G = group_heads
    assert H % G == 0, (H, G)
    n_groups = H // G
    dtype = para.dtype if dtype is None else dtype
    p = para[0].astype(dtype).reshape(n_groups, G, K, N)
    w = jnp.zeros((n_groups, G * K, G * N), dtype=dtype)
    for j in range(G):  # G is small and static; runs once at init
        w = w.at[:, j * K:(j + 1) * K, j * N:(j + 1) * N].set(p[:, j])
    return w


def head_dnn_forward(feature, w_groups, *, row_tile=1024):
    """relu(feature @ para): feature (B,H,M,K), grouped weights from
    build_grouped_weight(para).  Returns (B, H, M, N) in feature.dtype."""
    B, H, M, K = feature.shape
    n_groups, GK, GN = w_groups.shape
    G = H // n_groups
    assert GK == G * K, (GK, G, K)
    N = GN // G
    BM, HK, HN = B * M, H * K, H * N

    # Lane-dense activation slab, columns head-major: col = h*K + k.
    # TODO(synk): layout plumbing -- fuse into the producer in a real model.
    a = feature.transpose(0, 2, 1, 3).reshape(BM, HK)
    if a.dtype != w_groups.dtype:
        a = a.astype(w_groups.dtype)  # e.g. bf16 operand streams, f32 acc

    # Row tiling: prefer a tile that divides B*M (no pad); pad only as a
    # fallback when B*M is not a multiple of 8.
    if BM % 8 == 0:
        tm = min(BM, row_tile)
        while BM % tm:
            tm -= 8
        rows_padded = BM
    else:
        tm = min(((BM + 7) // 8) * 8, row_tile)
        rows_padded = -(-BM // tm) * tm
        a = jnp.pad(a, ((0, rows_padded - BM), (0, 0)))  # relu(0 @ W) = 0 rows
    n_row_tiles = rows_padded // tm

    out_dtype = feature.dtype
    out_itemsize = jnp.dtype(out_dtype).itemsize
    in_itemsize = jnp.dtype(a.dtype).itemsize

    # Raise the scoped-VMEM limit only if the double-buffered tiles need it
    # (v5e scoped default is 16 MiB; v6e/v7x 32 MiB).
    vmem_need = int(
        1.25 * (2 * tm * GK * in_itemsize        # A tile, double buffered
                + 2 * tm * GN * out_itemsize     # out tile, double buffered
                + 2 * GK * GN * in_itemsize)     # group weight
        + (1 << 20)
    )
    vmem_limit = vmem_need if vmem_need > (16 << 20) else None

    cost = pl.CostEstimate(
        flops=2 * rows_padded * GK * GN * n_groups,
        bytes_accessed=(rows_padded * HK * in_itemsize
                        + n_groups * GK * GN * in_itemsize
                        + rows_padded * HN * out_itemsize),
        transcendentals=0,
    )

    out2d = pl.pallas_call(
        _head_dnn_kernel,
        out_shape=jax.ShapeDtypeStruct((rows_padded, HN), out_dtype),
        grid_spec=pltpu.PrefetchScalarGridSpec(
            num_scalar_prefetch=0,
            # Head groups outer, row tiles inner: the group weight block stays
            # resident in VMEM across all row tiles of a group.
            grid=(n_groups, n_row_tiles),
            in_specs=[
                pl.BlockSpec((tm, GK), lambda g, i: (i, g)),
                pl.BlockSpec((None, GK, GN), lambda g, i: (g, 0, 0)),
            ],
            out_specs=pl.BlockSpec((tm, GN), lambda g, i: (i, g)),
        ),
        compiler_params=pltpu.CompilerParams(
            # Both axes independent (no carried accumulator) -> shardable
            # across v7x's two TensorCores; harmless on v5e/v6e.
            dimension_semantics=("parallel", "parallel"),
            vmem_limit_bytes=vmem_limit,
        ),
        cost_estimate=cost,
        # pipeline_mode=pl.Buffered(3) on the A/out specs is a further option
        # if profiling shows exposed DMA at large B*M.
    )(a, w_groups)

    # TODO(synk): layout plumbing -- fuse into the consumer in a real model.
    return out2d[:BM].reshape(B, M, H, N).transpose(0, 2, 1, 3)


if __name__ == "__main__":
    # Small shapes consistent with the module: head=4, inDim=32, outDim=32,
    # batch=2, M (fields per head) = 8.
    B, HEAD, M, IN_DIM, OUT_DIM = 2, 4, 8, 32, 32

    key = jax.random.PRNGKey(0)
    k_feat, k_para = jax.random.split(key)

    feature = jax.random.normal(k_feat, (B, HEAD, M, IN_DIM), dtype=jnp.float32)
    # nn.init.normal(mean=0, std=0.01) on the (1, head, inDim, outDim) parameter.
    para = 0.01 * jax.random.normal(
        k_para, (1, HEAD, IN_DIM, OUT_DIM), dtype=jnp.float32
    )

    # Hoisted weight build: pure function of para, computed once and reused.
    G = _choose_group_heads(HEAD, OUT_DIM, IN_DIM, _default_lane_group())
    w_f32 = build_grouped_weight(para, G)                       # f32 streams
    w_bf16 = build_grouped_weight(para, G, dtype=jnp.bfloat16)  # bf16 streams

    fwd = jax.jit(head_dnn_forward)

    # Reference (plain JAX, same semantics as torch.matmul + relu).
    ref = jnp.maximum(jnp.matmul(feature, para), 0.0)

    # f32 path: exact-ish.
    out = jax.block_until_ready(fwd(feature, w_f32))
    assert out.shape == (B, HEAD, M, OUT_DIM)
    assert jnp.allclose(out, ref, atol=1e-5, rtol=1e-5)

    # bf16 operand streams (f32 accumulate + f32 ReLU): looser tolerance is a
    # quantization decision, not a bug.
    out_bf = jax.block_until_ready(fwd(feature, w_bf16))
    assert out_bf.shape == (B, HEAD, M, OUT_DIM)
    assert jnp.allclose(out_bf, ref, atol=1e-2, rtol=5e-2)

    print("KERNEL_OK")
</pallas_src>

<mosaic_0001>
module attributes {stable_mosaic.version = 11 : i64} {
  func.func @_head_dnn_kernel(%arg0: i32, %arg1: i32, %arg2: memref<16x128xf32, #tpu.memory_space<vmem>>, %arg3: memref<1x128x128xf32, #tpu.memory_space<vmem>>, %arg4: memref<16x128xf32, #tpu.memory_space<vmem>>) attributes {dimension_semantics = [#tpu.dimension_semantics<parallel>, #tpu.dimension_semantics<parallel>], iteration_bounds = array<i64: 1, 1>, scalar_prefetch = 0 : i64, scratch_operands = 0 : i64, tpu.core_type = #tpu.core_type<tc>, window_params = [{transform_indices = @transform_0, window_bounds = array<i64: 16, 128>}, {transform_indices = @transform_1, window_bounds = array<i64: 1, 128, 128>}, {transform_indices = @transform_2, window_bounds = array<i64: 16, 128>}]} {
    %c0 = arith.constant 0 : index
    %c0_0 = arith.constant 0 : index
    %0 = vector.load %arg2[%c0, %c0_0] : memref<16x128xf32, #tpu.memory_space<vmem>>, vector<16x128xf32>
    %c0_1 = arith.constant 0 : index
    %c0_2 = arith.constant 0 : index
    %c0_3 = arith.constant 0 : index
    %1 = vector.load %arg3[%c0_1, %c0_2, %c0_3] : memref<1x128x128xf32, #tpu.memory_space<vmem>>, vector<1x128x128xf32>
    %2 = vector.shape_cast %1 : vector<1x128x128xf32> to vector<128x128xf32>
    %cst = arith.constant dense<0.000000e+00> : vector<16x128xf32>
    %3 = tpu.matmul %0, %2, %cst {dimension_numbers = #tpu.dot_dimension_numbers<[1], [0], [0], [1], [0, 0, 1, 1], [], []>} : vector<16x128xf32>, vector<128x128xf32>, vector<16x128xf32> -> vector<16x128xf32>
    %cst_4 = arith.constant 0.000000e+00 : f32
    %4 = vector.broadcast %cst_4 : f32 to vector<16x128xf32>
    %5 = arith.maximumf %3, %4 : vector<16x128xf32>
    %c0_5 = arith.constant 0 : index
    %c0_6 = arith.constant 0 : index
    %6 = vector.load %arg4[%c0_5, %c0_6] : memref<16x128xf32, #tpu.memory_space<vmem>>, vector<16x128xf32>
    tpu.vector_store %arg4[%c0_5, %c0_6], %5 {strides = array<i32>} : memref<16x128xf32, #tpu.memory_space<vmem>>, vector<16x128xf32>,
    return
  }
  func.func @transform_0(%arg0: i32, %arg1: i32) -> (i32, i32) {
    %c0_i32 = arith.constant 0 : i32
    return %arg1, %arg0 : i32, i32
  }
  func.func @transform_1(%arg0: i32, %arg1: i32) -> (i32, i32, i32) {
    %c0_i32 = arith.constant 0 : i32
    %c0_i32_0 = arith.constant 0 : i32
    %c0_i32_1 = arith.constant 0 : i32
    return %arg0, %c0_i32, %c0_i32_0 : i32, i32, i32
  }
  func.func @transform_2(%arg0: i32, %arg1: i32) -> (i32, i32) {
    %c0_i32 = arith.constant 0 : i32
    return %arg1, %arg0 : i32, i32
  }
}

</mosaic_0001>

<bundles_post_ra>
// kernel: head_dnn_forward.1
= control target key start
LH: loop header
LB: loop body
LE: loop exit
PB: predicated region body
PF: predicated region fallthrough
CT: control target
= control target key end

     0   :  { %s272_s1 = inlined_call_operand.vmem [shape: f32[1,128,128], index: 1, kind: input, shape index: {}]   ;;  %s273_s0 = inlined_call_operand.vmem [shape: f32[16,128], index: 0, kind: input, shape index: {}]   ;;  %s274_s2 = inlined_call_operand.vmem [shape: f32[16,128], index: 2, kind: output, shape index: {}]  }
   0x1   :  { %v13_v0 = vld [vmem:[%s272_s1] sm:$0xff]  ;;  %v14_v1 = vld [vmem:[%s272_s1 + $0x8] sm:$0xff]  ;;  %v15_v2 = vld [vmem:[%s272_s1 + $0x10] sm:$0xff] }
   0x2   :  { %v165_v3 = vpack.c.bf16 %v14_v1, %v13_v0  ;;  %v16_v4 = vld [vmem:[%s272_s1 + $0x18] sm:$0xff]  ;;  %v17_v6 = vld [vmem:[%s272_s1 + $0x20] sm:$0xff]  ;;  %v18_v7 = vld [vmem:[%s272_s1 + $0x28] sm:$0xff] }
   0x3   :  { %v169_v5 = vpack.c.bf16 %v16_v4, %v15_v2  ;;  %v173_v8 = vpack.c.bf16 %v18_v7, %v17_v6  ;;  %v11_v9 = vld [vmem:[%s273_s0] sm:$0xff]  ;;  %v19_v10 = vld [vmem:[%s272_s1 + $0x30] sm:$0xff]  ;;  %v20_v11 = vld [vmem:[%s272_s1 + $0x38] sm:$0xff] }
   0x4   :  { %166 = vmatprep.subr.bf16.mxu0 %v165_v3  ;;  %162 = vmatprep.mubr.f32.mxu0 %v11_v9  ;;  %v177_v12 = vpack.c.bf16 %v20_v11, %v19_v10  ;;  %v21_v13 = vld [vmem:[%s272_s1 + $0x40] sm:$0xff]  ;;  %v22_v14 = vld [vmem:[%s272_s1 + $0x48] sm:$0xff]  ;;  %v23_v16 = vld [vmem:[%s272_s1 + $0x50] sm:$0xff] }
   0x5   :  { %168 = vmatpush3.bf16.msra.mxu0 %v165_v3  ;;  %v181_v15 = vpack.c.bf16 %v22_v14, %v21_v13  ;;  %v24_v17 = vld [vmem:[%s272_s1 + $0x58] sm:$0xff]  ;;  %v25_v19 = vld [vmem:[%s272_s1 + $0x60] sm:$0xff]  ;;  %v26_v20 = vld [vmem:[%s272_s1 + $0x68] sm:$0xff] }
   0x6   :  { %170 = vmatprep.subr.bf16.mxu0 %v169_v5  ;;  %v185_v18 = vpack.c.bf16 %v24_v17, %v23_v16  ;;  %v189_v21 = vpack.c.bf16 %v26_v20, %v25_v19  ;;  %v27_v22 = vld [vmem:[%s272_s1 + $0x70] sm:$0xff]  ;;  %v28_v23 = vld [vmem:[%s272_s1 + $0x78] sm:$0xff]  ;;  %v12_v25 = vld [vmem:[%s273_s0 + $0x8] sm:$0xff] }
   0x7   :  { %v193_v24 = vpack.c.bf16 %v28_v23, %v27_v22 }
   0x9   :  { %172 = vmatpush3.bf16.msra.mxu0 %v169_v5 }
   0xa   :  { %174 = vmatprep.subr.bf16.mxu0 %v173_v8 }
   0xd   :  { %176 = vmatpush3.bf16.msra.mxu0 %v173_v8 }
   0xe   :  { %178 = vmatprep.subr.bf16.mxu0 %v177_v12 }
  0x11   :  { %180 = vmatpush3.bf16.msra.mxu0 %v177_v12 }
  0x12   :  { %182 = vmatprep.subr.bf16.mxu0 %v181_v15 }
  0x15   :  { %184 = vmatpush3.bf16.msra.mxu0 %v181_v15 }
  0x16   :  { %186 = vmatprep.subr.bf16.mxu0 %v185_v18 }
  0x19   :  { %188 = vmatpush3.bf16.msra.mxu0 %v185_v18 }
  0x1a   :  { %190 = vmatprep.subr.bf16.mxu0 %v189_v21 }
  0x1d   :  { %192 = vmatpush3.bf16.msra.mxu0 %v189_v21 }
  0x1e   :  { %194 = vmatprep.subr.bf16.mxu0 %v193_v24 }
  0x21   :  { %196 = vmatpush3.bf16.msra.mxu0 %v193_v24 }
  0x24   :  { %163 = vmatmul.mubr.f32.vlgmr.msra.gmra.mrb[0].mxu0 %v12_v25 }
  0xf7   :  { %v164_v26 = vpop.f32.mrb[0].mxu0 }
  0xf8   :  { %v105_v27 = vmax.f32 %v164_v26, 0.0  ;;  %v95_v28 = vpop.f32.mrb[1].mxu0 }
  0xf9   :  { %v104_v29 = vmax.f32 %v95_v28, 0.0 }
  0xfa   :  { %107 = vst [vmem:[%s274_s2 + $0x8] sm:$0xff] %v105_v27 }
  0xfb   :  { %106 = vst [vmem:[%s274_s2] sm:$0xff] %v104_v29 }

</bundles_post_ra>
